<compile_context>
chip_gen: v7x
topology: tpu7x:2x2x1
jax: 0.10.0
libtpu: 0.0.40
codegen_flags: <defaults>
</compile_context>

<pallas_src>
import functools

import jax
import jax.numpy as jnp
from jax.experimental import pallas as pl
from jax.experimental.pallas import tpu as pltpu


_NEG_BIG = -9e15          # adjacency mask value (matches the PyTorch reference)
_CLASS_PAD = 128          # lane-dense class slab width for the output layer


def _elu(x):
    # exp only on the clamped negative branch: no overflow in unselected lanes.
    return jnp.where(x > 0, x, jnp.exp(jnp.minimum(x, 0.0)) - 1.0)


def _leaky_relu(x, alpha):
    return jnp.where(x > 0, x, alpha * x)


def _softmax_rows(att):
    att = jnp.exp(att - jnp.max(att, axis=1, keepdims=True))
    return att * pl.reciprocal(jnp.sum(att, axis=1, keepdims=True), approx=True)


def _gat_fused_kernel(x_ref, bias_ref, wall_ref, ablk_ref, wo_ref, ao_ref,
                      out_ref, h_scr, *, alpha, nheads, nhid, nclass):
    """Fused GAT forward: nheads concat=True heads + output head + log_softmax.

    x_ref    : (N, Fi)              bf16  node features
    bias_ref : (N, N)               bf16  adjacency bias (0 on edges, -9e15 off)
    wall_ref : (Fi, nheads*Fo)      bf16  concatenated per-head W
    ablk_ref : (nheads*Fo, 2*H)     bf16  block-diagonal packed attention vectors
    wo_ref   : (nheads*Fo, Cpad)    bf16  output W, class dim zero-padded to 128
    ao_ref   : (Cpad, 2)            bf16  output attention vectors [a1 | a2]
    out_ref  : (N, Cpad)            f32   log-probabilities (padded lanes junk)
    h_scr    : (N, nheads*Fo)       bf16  VMEM scratch for the hidden activation
    """
    x = x_ref[...]                                   # (N, Fi)  bf16
    bias = bias_ref[...].astype(jnp.float32)         # (N, N)   f32

    # ---------------- hidden layer: all heads, batched matmuls ----------------
    # One MXU pass for every head's linear transform.
    wh_all_f32 = jnp.dot(x, wall_ref[...], preferred_element_type=jnp.float32)
    wh_all = wh_all_f32.astype(jnp.bfloat16)         # (N, H*Fo) bf16

    # One MXU pass for every head's two attention projections.
    proj = jnp.dot(wh_all, ablk_ref[...], preferred_element_type=jnp.float32)
    src = proj[:, :nheads]                           # (N, H)  Wh_h @ a1_h
    dst_t = proj[:, nheads:].T                       # (H, N)  (Wh_h @ a2_h)^T, one relayout

    for hd in range(nheads):                         # static unroll over heads
        e = src[:, hd:hd + 1] + dst_t[hd:hd + 1, :]  # (N, N) logits
        att = _softmax_rows(_leaky_relu(e, alpha) + bias)
        wh_h = wh_all[:, hd * nhid:(hd + 1) * nhid]  # (N, Fo) bf16
        agg = jnp.dot(att.astype(jnp.bfloat16), wh_h,
                      preferred_element_type=jnp.float32)
        # Write straight into the hidden slab at this head's lane offset.
        h_scr[:, hd * nhid:(hd + 1) * nhid] = _elu(agg).astype(h_scr.dtype)
    # TODO(synk): attention / feature dropout omitted (inference, training=False).

    # ---------------- output layer (concat=False) on padded class slab --------
    h = h_scr[...]                                   # (N, H*Fo) bf16
    who_f32 = jnp.dot(h, wo_ref[...], preferred_element_type=jnp.float32)
    who = who_f32.astype(jnp.bfloat16)               # (N, Cpad) bf16 (zero beyond nclass)

    proj_o = jnp.dot(who, ao_ref[...], preferred_element_type=jnp.float32)  # (N, 2)
    e = proj_o[:, 0:1] + proj_o[:, 1:2].T
    att = _softmax_rows(_leaky_relu(e, alpha) + bias)
    agg = jnp.dot(att.astype(jnp.bfloat16), who, preferred_element_type=jnp.float32)
    y = _elu(agg)                                    # (N, Cpad) f32

    # log_softmax over the real classes only; padded lanes masked off.
    col = jax.lax.broadcasted_iota(jnp.int32, y.shape, 1)
    y = jnp.where(col < nclass, y, -1e30)
    y = y - jnp.max(y, axis=1, keepdims=True)
    y = y - jnp.log(jnp.sum(jnp.exp(y), axis=1, keepdims=True))
    out_ref[...] = y.astype(out_ref.dtype)           # single lane-dense f32 store


def _vmem_limit_bytes(N, nfeat, nhid, nheads, cpad):
    bf16, f32 = 2, 4
    fh = nheads * nhid
    static = (N * nfeat * bf16 + N * N * bf16 + nfeat * fh * bf16
              + fh * 2 * nheads * bf16 + fh * cpad * bf16 + cpad * 2 * bf16
              + N * cpad * f32 + N * fh * bf16)
    live = N * fh * f32 + 3 * N * N * f32 + 2 * N * cpad * f32
    est = 2 * static + live + (8 << 20)              # double-buffered IO + slack
    return int(min(max(est, 16 << 20), 60 << 20))    # stay under the v7x 64 MiB cap


def gat_forward(x, adj, kparams, *, alpha, nclass, nheads, nhid):
    """Full GAT forward. F.dropout with training=False -> identity."""
    N, nfeat = x.shape
    cpad = kparams["wo_pad"].shape[1]
    # Adjacency mask hoisted out of the kernel, stored bf16 (half the N^2 bytes).
    adj_bias = jnp.where(adj > 0, 0.0, _NEG_BIG).astype(jnp.bfloat16)
    vmem = pl.BlockSpec(memory_space=pltpu.MemorySpace.VMEM)
    kernel = functools.partial(_gat_fused_kernel, alpha=alpha, nheads=nheads,
                               nhid=nhid, nclass=nclass)
    out = pl.pallas_call(
        kernel,
        out_shape=jax.ShapeDtypeStruct((N, cpad), jnp.float32),
        in_specs=[vmem] * 6,
        out_specs=vmem,
        scratch_shapes=[pltpu.VMEM((N, nheads * nhid), jnp.bfloat16)],
        compiler_params=pltpu.CompilerParams(
            vmem_limit_bytes=_vmem_limit_bytes(N, nfeat, nhid, nheads, cpad)),
    )(x.astype(jnp.bfloat16), adj_bias, kparams["w_all"], kparams["a_blk"],
      kparams["wo_pad"], kparams["ao_pad"])
    return out[:, :nclass]                           # drop the lane padding


def init_gat_params(key, nfeat, nhid, nclass, nheads):
    """Deterministic synthetic parameters, pre-packed for the fused kernel."""
    cpad = max(_CLASS_PAD, ((nclass + 127) // 128) * 128)
    Ws, A1s, A2s = [], [], []
    for _ in range(nheads):
        key, k1, k2 = jax.random.split(key, 3)
        W = jax.random.normal(k1, (nfeat, nhid), jnp.float32) / jnp.sqrt(nfeat)
        a = jax.random.normal(k2, (2 * nhid, 1), jnp.float32) / jnp.sqrt(2 * nhid)
        Ws.append(W)
        A1s.append(a[:nhid, 0])
        A2s.append(a[nhid:, 0])
    key, k1, k2 = jax.random.split(key, 3)
    Wo = jax.random.normal(k1, (nhid * nheads, nclass), jnp.float32) / jnp.sqrt(nhid * nheads)
    ao = jax.random.normal(k2, (2 * nclass, 1), jnp.float32) / jnp.sqrt(2 * nclass)

    # Batched per-head linear transform: (Fi, nheads*Fo).
    w_all = jnp.concatenate(Ws, axis=1)
    # Block-diagonal packed attention vectors: cols [0:H] = a1, [H:2H] = a2.
    a_blk = jnp.zeros((nheads * nhid, 2 * nheads), jnp.float32)
    for h in range(nheads):
        a_blk = a_blk.at[h * nhid:(h + 1) * nhid, h].set(A1s[h])
        a_blk = a_blk.at[h * nhid:(h + 1) * nhid, nheads + h].set(A2s[h])
    # Lane-dense padding of the output layer's class dimension.
    wo_pad = jnp.zeros((nhid * nheads, cpad), jnp.float32).at[:, :nclass].set(Wo)
    ao_pad = jnp.zeros((cpad, 2), jnp.float32)
    ao_pad = ao_pad.at[:nclass, 0].set(ao[:nclass, 0]).at[:nclass, 1].set(ao[nclass:, 0])

    kparams = {
        "w_all": w_all.astype(jnp.bfloat16),     # (nfeat, nheads*nhid)
        "a_blk": a_blk.astype(jnp.bfloat16),     # (nheads*nhid, 2*nheads)
        "wo_pad": wo_pad.astype(jnp.bfloat16),   # (nheads*nhid, 128)
        "ao_pad": ao_pad.astype(jnp.bfloat16),   # (128, 2)
    }
    ref_params = {"Ws": Ws, "A1s": A1s, "A2s": A2s,
                  "Wo": Wo, "ao1": ao[:nclass, 0], "ao2": ao[nclass:, 0]}
    return kparams, ref_params


def gat_reference(x, adj, ref_params, *, alpha):
    """Pure-JAX f32 reference matching the PyTorch module (training=False)."""
    def head(h, W, a1, a2):
        Wh = h @ W
        e = (Wh @ a1)[:, None] + (Wh @ a2)[None, :]
        e = jnp.where(e > 0, e, alpha * e)
        att = jnp.where(adj > 0, e, _NEG_BIG)
        att = jax.nn.softmax(att, axis=1)
        return att @ Wh

    hs = [jax.nn.elu(head(x, W, a1, a2))
          for W, a1, a2 in zip(ref_params["Ws"], ref_params["A1s"], ref_params["A2s"])]
    h = jnp.concatenate(hs, axis=1)
    y = jax.nn.elu(head(h, ref_params["Wo"], ref_params["ao1"], ref_params["ao2"]))
    return jax.nn.log_softmax(y, axis=1)


if __name__ == "__main__":
    # Small, deterministic problem.
    N, nfeat, nhid, nclass, nheads = 16, 32, 16, 8, 4
    alpha = 0.2

    key = jax.random.PRNGKey(0)
    key, kx, ka, kp = jax.random.split(key, 4)

    x = jax.random.normal(kx, (N, nfeat), jnp.float32)
    # Random sparse-ish symmetric adjacency with self loops.
    adj = (jax.random.uniform(ka, (N, N)) > 0.7).astype(jnp.float32)
    adj = jnp.maximum(adj, adj.T)
    adj = jnp.maximum(adj, jnp.eye(N, dtype=jnp.float32))

    kparams, ref_params = init_gat_params(kp, nfeat, nhid, nclass, nheads)

    out = gat_forward(x, adj, kparams, alpha=alpha, nclass=nclass,
                      nheads=nheads, nhid=nhid)
    out = jax.block_until_ready(out)

    assert out.shape == (N, nclass), out.shape
    assert bool(jnp.all(jnp.isfinite(out)))
    # log_softmax rows should exponentiate-sum to ~1.
    assert bool(jnp.allclose(jnp.sum(jnp.exp(out), axis=1), 1.0, atol=1e-4))
    # Loose check against the f32 reference (kernel runs bf16 MXU + approx recip).
    ref = gat_reference(x, adj, ref_params, alpha=alpha)
    assert bool(jnp.allclose(out, ref, atol=0.25)), float(jnp.max(jnp.abs(out - ref)))

    print("KERNEL_OK")
</pallas_src>

<mosaic_0001>
module attributes {stable_mosaic.version = 11 : i64} {
  func.func @_gat_fused_kernel(%arg0: memref<16x32xbf16, #tpu.memory_space<vmem>>, %arg1: memref<16x16xbf16, #tpu.memory_space<vmem>>, %arg2: memref<32x64xbf16, #tpu.memory_space<vmem>>, %arg3: memref<64x8xbf16, #tpu.memory_space<vmem>>, %arg4: memref<64x128xbf16, #tpu.memory_space<vmem>>, %arg5: memref<128x2xbf16, #tpu.memory_space<vmem>>, %arg6: memref<16x128xf32, #tpu.memory_space<vmem>>, %arg7: memref<16x64xbf16, #tpu.memory_space<vmem>>) attributes {dimension_semantics = [], scalar_prefetch = 0 : i64, scratch_operands = 1 : i64, tpu.core_type = #tpu.core_type<tc>} {
    %c0 = arith.constant 0 : index
    %c0_0 = arith.constant 0 : index
    %0 = vector.load %arg0[%c0, %c0_0] : memref<16x32xbf16, #tpu.memory_space<vmem>>, vector<16x32xbf16>
    %c0_1 = arith.constant 0 : index
    %c0_2 = arith.constant 0 : index
    %1 = vector.load %arg1[%c0_1, %c0_2] : memref<16x16xbf16, #tpu.memory_space<vmem>>, vector<16x16xbf16>
    %2 = arith.extf %1 : vector<16x16xbf16> to vector<16x16xf32>
    %c0_3 = arith.constant 0 : index
    %c0_4 = arith.constant 0 : index
    %3 = vector.load %arg2[%c0_3, %c0_4] : memref<32x64xbf16, #tpu.memory_space<vmem>>, vector<32x64xbf16>
    %cst = arith.constant dense<0.000000e+00> : vector<16x64xf32>
    %4 = tpu.matmul %0, %3, %cst {dimension_numbers = #tpu.dot_dimension_numbers<[1], [0], [0], [1], [0, 0, 1, 1], [], []>} : vector<16x32xbf16>, vector<32x64xbf16>, vector<16x64xf32> -> vector<16x64xf32>
    %5 = arith.truncf %4 : vector<16x64xf32> to vector<16x64xbf16>
    %c0_5 = arith.constant 0 : index
    %c0_6 = arith.constant 0 : index
    %6 = vector.load %arg3[%c0_5, %c0_6] : memref<64x8xbf16, #tpu.memory_space<vmem>>, vector<64x8xbf16>
    %cst_7 = arith.constant dense<0.000000e+00> : vector<16x8xf32>
    %7 = tpu.matmul %5, %6, %cst_7 {dimension_numbers = #tpu.dot_dimension_numbers<[1], [0], [0], [1], [0, 0, 1, 1], [], []>} : vector<16x64xbf16>, vector<64x8xbf16>, vector<16x8xf32> -> vector<16x8xf32>
    %8 = vector.extract_strided_slice %7 {offsets = [0, 0], sizes = [16, 4], strides = [1, 1]} : vector<16x8xf32> to vector<16x4xf32>
    %9 = vector.extract_strided_slice %7 {offsets = [0, 4], sizes = [16, 4], strides = [1, 1]} : vector<16x8xf32> to vector<16x4xf32>
    %10 = tpu.transpose %9, [1, 0] : vector<16x4xf32> -> vector<4x16xf32>
    %11 = vector.extract_strided_slice %8 {offsets = [0, 0], sizes = [16, 1], strides = [1, 1]} : vector<16x4xf32> to vector<16x1xf32>
    %12 = vector.extract_strided_slice %10 {offsets = [0, 0], sizes = [1, 16], strides = [1, 1]} : vector<4x16xf32> to vector<1x16xf32>
    %13 = vector.broadcast %11 : vector<16x1xf32> to vector<16x16xf32>
    %14 = vector.broadcast %12 : vector<1x16xf32> to vector<16x16xf32>
    %15 = arith.addf %13, %14 : vector<16x16xf32>
    %cst_8 = arith.constant 0.000000e+00 : f32
    %16 = vector.broadcast %cst_8 : f32 to vector<16x16xf32>
    %17 = arith.cmpf ogt, %15, %16 : vector<16x16xf32>
    %cst_9 = arith.constant 2.000000e-01 : f32
    %18 = vector.broadcast %cst_9 : f32 to vector<16x16xf32>
    %19 = arith.mulf %18, %15 : vector<16x16xf32>
    %20 = arith.select %17, %15, %19 : vector<16x16xi1>, vector<16x16xf32>
    %21 = arith.addf %20, %2 : vector<16x16xf32>
    %cst_10 = arith.constant dense<0xFF800000> : vector<16xf32>
    %22 = vector.multi_reduction <maximumf>, %21, %cst_10 [1] : vector<16x16xf32> to vector<16xf32>
    %23 = vector.shape_cast %22 : vector<16xf32> to vector<16x1xf32>
    %24 = vector.broadcast %23 : vector<16x1xf32> to vector<16x16xf32>
    %25 = arith.subf %21, %24 : vector<16x16xf32>
    %26 = math.exp %25 : vector<16x16xf32>
    %cst_11 = arith.constant dense<0.000000e+00> : vector<16xf32>
    %27 = vector.multi_reduction <add>, %26, %cst_11 [1] : vector<16x16xf32> to vector<16xf32>
    %28 = vector.shape_cast %27 : vector<16xf32> to vector<16x1xf32>
    %29 = tpu.reciprocal %28 {approx = true} : vector<16x1xf32> -> vector<16x1xf32>
    %30 = vector.broadcast %29 : vector<16x1xf32> to vector<16x16xf32>
    %31 = arith.mulf %26, %30 : vector<16x16xf32>
    %32 = vector.extract_strided_slice %5 {offsets = [0, 0], sizes = [16, 16], strides = [1, 1]} : vector<16x64xbf16> to vector<16x16xbf16>
    %33 = arith.truncf %31 : vector<16x16xf32> to vector<16x16xbf16>
    %cst_12 = arith.constant dense<0.000000e+00> : vector<16x16xf32>
    %34 = tpu.matmul %33, %32, %cst_12 {dimension_numbers = #tpu.dot_dimension_numbers<[1], [0], [0], [1], [0, 0, 1, 1], [], []>} : vector<16x16xbf16>, vector<16x16xbf16>, vector<16x16xf32> -> vector<16x16xf32>
    %cst_13 = arith.constant 0.000000e+00 : f32
    %35 = vector.broadcast %cst_13 : f32 to vector<16x16xf32>
    %36 = arith.cmpf ogt, %34, %35 : vector<16x16xf32>
    %cst_14 = arith.constant 0.000000e+00 : f32
    %37 = vector.broadcast %cst_14 : f32 to vector<16x16xf32>
    %38 = arith.minimumf %34, %37 : vector<16x16xf32>
    %39 = math.exp %38 : vector<16x16xf32>
    %cst_15 = arith.constant 1.000000e+00 : f32
    %40 = vector.broadcast %cst_15 : f32 to vector<16x16xf32>
    %41 = arith.subf %39, %40 : vector<16x16xf32>
    %42 = arith.select %36, %34, %41 : vector<16x16xi1>, vector<16x16xf32>
    %43 = arith.truncf %42 : vector<16x16xf32> to vector<16x16xbf16>
    %c0_16 = arith.constant 0 : index
    %c0_17 = arith.constant 0 : index
    %44 = vector.load %arg7[%c0_16, %c0_17] : memref<16x64xbf16, #tpu.memory_space<vmem>>, vector<16x16xbf16>
    tpu.vector_store %arg7[%c0_16, %c0_17], %43 {strides = array<i32>} : memref<16x64xbf16, #tpu.memory_space<vmem>>, vector<16x16xbf16>,
    %45 = vector.extract_strided_slice %8 {offsets = [0, 1], sizes = [16, 1], strides = [1, 1]} : vector<16x4xf32> to vector<16x1xf32>
    %46 = vector.extract_strided_slice %10 {offsets = [1, 0], sizes = [1, 16], strides = [1, 1]} : vector<4x16xf32> to vector<1x16xf32>
    %47 = vector.broadcast %45 : vector<16x1xf32> to vector<16x16xf32>
    %48 = vector.broadcast %46 : vector<1x16xf32> to vector<16x16xf32>
    %49 = arith.addf %47, %48 : vector<16x16xf32>
    %cst_18 = arith.constant 0.000000e+00 : f32
    %50 = vector.broadcast %cst_18 : f32 to vector<16x16xf32>
    %51 = arith.cmpf ogt, %49, %50 : vector<16x16xf32>
    %cst_19 = arith.constant 2.000000e-01 : f32
    %52 = vector.broadcast %cst_19 : f32 to vector<16x16xf32>
    %53 = arith.mulf %52, %49 : vector<16x16xf32>
    %54 = arith.select %51, %49, %53 : vector<16x16xi1>, vector<16x16xf32>
    %55 = arith.addf %54, %2 : vector<16x16xf32>
    %cst_20 = arith.constant dense<0xFF800000> : vector<16xf32>
    %56 = vector.multi_reduction <maximumf>, %55, %cst_20 [1] : vector<16x16xf32> to vector<16xf32>
    %57 = vector.shape_cast %56 : vector<16xf32> to vector<16x1xf32>
    %58 = vector.broadcast %57 : vector<16x1xf32> to vector<16x16xf32>
    %59 = arith.subf %55, %58 : vector<16x16xf32>
    %60 = math.exp %59 : vector<16x16xf32>
    %cst_21 = arith.constant dense<0.000000e+00> : vector<16xf32>
    %61 = vector.multi_reduction <add>, %60, %cst_21 [1] : vector<16x16xf32> to vector<16xf32>
    %62 = vector.shape_cast %61 : vector<16xf32> to vector<16x1xf32>
    %63 = tpu.reciprocal %62 {approx = true} : vector<16x1xf32> -> vector<16x1xf32>
    %64 = vector.broadcast %63 : vector<16x1xf32> to vector<16x16xf32>
    %65 = arith.mulf %60, %64 : vector<16x16xf32>
    %66 = vector.extract_strided_slice %5 {offsets = [0, 16], sizes = [16, 16], strides = [1, 1]} : vector<16x64xbf16> to vector<16x16xbf16>
    %67 = arith.truncf %65 : vector<16x16xf32> to vector<16x16xbf16>
    %cst_22 = arith.constant dense<0.000000e+00> : vector<16x16xf32>
    %68 = tpu.matmul %67, %66, %cst_22 {dimension_numbers = #tpu.dot_dimension_numbers<[1], [0], [0], [1], [0, 0, 1, 1], [], []>} : vector<16x16xbf16>, vector<16x16xbf16>, vector<16x16xf32> -> vector<16x16xf32>
    %cst_23 = arith.constant 0.000000e+00 : f32
    %69 = vector.broadcast %cst_23 : f32 to vector<16x16xf32>
    %70 = arith.cmpf ogt, %68, %69 : vector<16x16xf32>
    %cst_24 = arith.constant 0.000000e+00 : f32
    %71 = vector.broadcast %cst_24 : f32 to vector<16x16xf32>
    %72 = arith.minimumf %68, %71 : vector<16x16xf32>
    %73 = math.exp %72 : vector<16x16xf32>
    %cst_25 = arith.constant 1.000000e+00 : f32
    %74 = vector.broadcast %cst_25 : f32 to vector<16x16xf32>
    %75 = arith.subf %73, %74 : vector<16x16xf32>
    %76 = arith.select %70, %68, %75 : vector<16x16xi1>, vector<16x16xf32>
    %77 = arith.truncf %76 : vector<16x16xf32> to vector<16x16xbf16>
    %c0_26 = arith.constant 0 : index
    %c16 = arith.constant 16 : index
    %78 = vector.load %arg7[%c0_26, %c16] : memref<16x64xbf16, #tpu.memory_space<vmem>>, vector<16x16xbf16>
    tpu.vector_store %arg7[%c0_26, %c16], %77 {strides = array<i32>} : memref<16x64xbf16, #tpu.memory_space<vmem>>, vector<16x16xbf16>,
    %79 = vector.extract_strided_slice %8 {offsets = [0, 2], sizes = [16, 1], strides = [1, 1]} : vector<16x4xf32> to vector<16x1xf32>
    %80 = vector.extract_strided_slice %10 {offsets = [2, 0], sizes = [1, 16], strides = [1, 1]} : vector<4x16xf32> to vector<1x16xf32>
    %81 = vector.broadcast %79 : vector<16x1xf32> to vector<16x16xf32>
    %82 = vector.broadcast %80 : vector<1x16xf32> to vector<16x16xf32>
    %83 = arith.addf %81, %82 : vector<16x16xf32>
    %cst_27 = arith.constant 0.000000e+00 : f32
    %84 = vector.broadcast %cst_27 : f32 to vector<16x16xf32>
    %85 = arith.cmpf ogt, %83, %84 : vector<16x16xf32>
    %cst_28 = arith.constant 2.000000e-01 : f32
    %86 = vector.broadcast %cst_28 : f32 to vector<16x16xf32>
    %87 = arith.mulf %86, %83 : vector<16x16xf32>
    %88 = arith.select %85, %83, %87 : vector<16x16xi1>, vector<16x16xf32>
    %89 = arith.addf %88, %2 : vector<16x16xf32>
    %cst_29 = arith.constant dense<0xFF800000> : vector<16xf32>
    %90 = vector.multi_reduction <maximumf>, %89, %cst_29 [1] : vector<16x16xf32> to vector<16xf32>
    %91 = vector.shape_cast %90 : vector<16xf32> to vector<16x1xf32>
    %92 = vector.broadcast %91 : vector<16x1xf32> to vector<16x16xf32>
    %93 = arith.subf %89, %92 : vector<16x16xf32>
    %94 = math.exp %93 : vector<16x16xf32>
    %cst_30 = arith.constant dense<0.000000e+00> : vector<16xf32>
    %95 = vector.multi_reduction <add>, %94, %cst_30 [1] : vector<16x16xf32> to vector<16xf32>
    %96 = vector.shape_cast %95 : vector<16xf32> to vector<16x1xf32>
    %97 = tpu.reciprocal %96 {approx = true} : vector<16x1xf32> -> vector<16x1xf32>
    %98 = vector.broadcast %97 : vector<16x1xf32> to vector<16x16xf32>
    %99 = arith.mulf %94, %98 : vector<16x16xf32>
    %100 = vector.extract_strided_slice %5 {offsets = [0, 32], sizes = [16, 16], strides = [1, 1]} : vector<16x64xbf16> to vector<16x16xbf16>
    %101 = arith.truncf %99 : vector<16x16xf32> to vector<16x16xbf16>
    %cst_31 = arith.constant dense<0.000000e+00> : vector<16x16xf32>
    %102 = tpu.matmul %101, %100, %cst_31 {dimension_numbers = #tpu.dot_dimension_numbers<[1], [0], [0], [1], [0, 0, 1, 1], [], []>} : vector<16x16xbf16>, vector<16x16xbf16>, vector<16x16xf32> -> vector<16x16xf32>
    %cst_32 = arith.constant 0.000000e+00 : f32
    %103 = vector.broadcast %cst_32 : f32 to vector<16x16xf32>
    %104 = arith.cmpf ogt, %102, %103 : vector<16x16xf32>
    %cst_33 = arith.constant 0.000000e+00 : f32
    %105 = vector.broadcast %cst_33 : f32 to vector<16x16xf32>
    %106 = arith.minimumf %102, %105 : vector<16x16xf32>
    %107 = math.exp %106 : vector<16x16xf32>
    %cst_34 = arith.constant 1.000000e+00 : f32
    %108 = vector.broadcast %cst_34 : f32 to vector<16x16xf32>
    %109 = arith.subf %107, %108 : vector<16x16xf32>
    %110 = arith.select %104, %102, %109 : vector<16x16xi1>, vector<16x16xf32>
    %111 = arith.truncf %110 : vector<16x16xf32> to vector<16x16xbf16>
    %c0_35 = arith.constant 0 : index
    %c32 = arith.constant 32 : index
    %112 = vector.load %arg7[%c0_35, %c32] : memref<16x64xbf16, #tpu.memory_space<vmem>>, vector<16x16xbf16>
    tpu.vector_store %arg7[%c0_35, %c32], %111 {strides = array<i32>} : memref<16x64xbf16, #tpu.memory_space<vmem>>, vector<16x16xbf16>,
    %113 = vector.extract_strided_slice %8 {offsets = [0, 3], sizes = [16, 1], strides = [1, 1]} : vector<16x4xf32> to vector<16x1xf32>
    %114 = vector.extract_strided_slice %10 {offsets = [3, 0], sizes = [1, 16], strides = [1, 1]} : vector<4x16xf32> to vector<1x16xf32>
    %115 = vector.broadcast %113 : vector<16x1xf32> to vector<16x16xf32>
    %116 = vector.broadcast %114 : vector<1x16xf32> to vector<16x16xf32>
    %117 = arith.addf %115, %116 : vector<16x16xf32>
    %cst_36 = arith.constant 0.000000e+00 : f32
    %118 = vector.broadcast %cst_36 : f32 to vector<16x16xf32>
    %119 = arith.cmpf ogt, %117, %118 : vector<16x16xf32>
    %cst_37 = arith.constant 2.000000e-01 : f32
    %120 = vector.broadcast %cst_37 : f32 to vector<16x16xf32>
    %121 = arith.mulf %120, %117 : vector<16x16xf32>
    %122 = arith.select %119, %117, %121 : vector<16x16xi1>, vector<16x16xf32>
    %123 = arith.addf %122, %2 : vector<16x16xf32>
    %cst_38 = arith.constant dense<0xFF800000> : vector<16xf32>
    %124 = vector.multi_reduction <maximumf>, %123, %cst_38 [1] : vector<16x16xf32> to vector<16xf32>
    %125 = vector.shape_cast %124 : vector<16xf32> to vector<16x1xf32>
    %126 = vector.broadcast %125 : vector<16x1xf32> to vector<16x16xf32>
    %127 = arith.subf %123, %126 : vector<16x16xf32>
    %128 = math.exp %127 : vector<16x16xf32>
    %cst_39 = arith.constant dense<0.000000e+00> : vector<16xf32>
    %129 = vector.multi_reduction <add>, %128, %cst_39 [1] : vector<16x16xf32> to vector<16xf32>
    %130 = vector.shape_cast %129 : vector<16xf32> to vector<16x1xf32>
    %131 = tpu.reciprocal %130 {approx = true} : vector<16x1xf32> -> vector<16x1xf32>
    %132 = vector.broadcast %131 : vector<16x1xf32> to vector<16x16xf32>
    %133 = arith.mulf %128, %132 : vector<16x16xf32>
    %134 = vector.extract_strided_slice %5 {offsets = [0, 48], sizes = [16, 16], strides = [1, 1]} : vector<16x64xbf16> to vector<16x16xbf16>
    %135 = arith.truncf %133 : vector<16x16xf32> to vector<16x16xbf16>
    %cst_40 = arith.constant dense<0.000000e+00> : vector<16x16xf32>
    %136 = tpu.matmul %135, %134, %cst_40 {dimension_numbers = #tpu.dot_dimension_numbers<[1], [0], [0], [1], [0, 0, 1, 1], [], []>} : vector<16x16xbf16>, vector<16x16xbf16>, vector<16x16xf32> -> vector<16x16xf32>
    %cst_41 = arith.constant 0.000000e+00 : f32
    %137 = vector.broadcast %cst_41 : f32 to vector<16x16xf32>
    %138 = arith.cmpf ogt, %136, %137 : vector<16x16xf32>
    %cst_42 = arith.constant 0.000000e+00 : f32
    %139 = vector.broadcast %cst_42 : f32 to vector<16x16xf32>
    %140 = arith.minimumf %136, %139 : vector<16x16xf32>
    %141 = math.exp %140 : vector<16x16xf32>
    %cst_43 = arith.constant 1.000000e+00 : f32
    %142 = vector.broadcast %cst_43 : f32 to vector<16x16xf32>
    %143 = arith.subf %141, %142 : vector<16x16xf32>
    %144 = arith.select %138, %136, %143 : vector<16x16xi1>, vector<16x16xf32>
    %145 = arith.truncf %144 : vector<16x16xf32> to vector<16x16xbf16>
    %c0_44 = arith.constant 0 : index
    %c48 = arith.constant 48 : index
    %146 = vector.load %arg7[%c0_44, %c48] : memref<16x64xbf16, #tpu.memory_space<vmem>>, vector<16x16xbf16>
    tpu.vector_store %arg7[%c0_44, %c48], %145 {strides = array<i32>} : memref<16x64xbf16, #tpu.memory_space<vmem>>, vector<16x16xbf16>,
    %c0_45 = arith.constant 0 : index
    %c0_46 = arith.constant 0 : index
    %147 = vector.load %arg7[%c0_45, %c0_46] : memref<16x64xbf16, #tpu.memory_space<vmem>>, vector<16x64xbf16>
    %c0_47 = arith.constant 0 : index
    %c0_48 = arith.constant 0 : index
    %148 = vector.load %arg4[%c0_47, %c0_48] : memref<64x128xbf16, #tpu.memory_space<vmem>>, vector<64x128xbf16>
    %cst_49 = arith.constant dense<0.000000e+00> : vector<16x128xf32>
    %149 = tpu.matmul %147, %148, %cst_49 {dimension_numbers = #tpu.dot_dimension_numbers<[1], [0], [0], [1], [0, 0, 1, 1], [], []>} : vector<16x64xbf16>, vector<64x128xbf16>, vector<16x128xf32> -> vector<16x128xf32>
    %150 = arith.truncf %149 : vector<16x128xf32> to vector<16x128xbf16>
    %c0_50 = arith.constant 0 : index
    %c0_51 = arith.constant 0 : index
    %151 = vector.load %arg5[%c0_50, %c0_51] : memref<128x2xbf16, #tpu.memory_space<vmem>>, vector<128x2xbf16>
    %cst_52 = arith.constant dense<0.000000e+00> : vector<16x2xf32>
    %152 = tpu.matmul %150, %151, %cst_52 {dimension_numbers = #tpu.dot_dimension_numbers<[1], [0], [0], [1], [0, 0, 1, 1], [], []>} : vector<16x128xbf16>, vector<128x2xbf16>, vector<16x2xf32> -> vector<16x2xf32>
    %153 = vector.extract_strided_slice %152 {offsets = [0, 0], sizes = [16, 1], strides = [1, 1]} : vector<16x2xf32> to vector<16x1xf32>
    %154 = vector.extract_strided_slice %152 {offsets = [0, 1], sizes = [16, 1], strides = [1, 1]} : vector<16x2xf32> to vector<16x1xf32>
    %155 = tpu.transpose %154, [1, 0] : vector<16x1xf32> -> vector<1x16xf32>
    %156 = vector.broadcast %153 : vector<16x1xf32> to vector<16x16xf32>
    %157 = vector.broadcast %155 : vector<1x16xf32> to vector<16x16xf32>
    %158 = arith.addf %156, %157 : vector<16x16xf32>
    %cst_53 = arith.constant 0.000000e+00 : f32
    %159 = vector.broadcast %cst_53 : f32 to vector<16x16xf32>
    %160 = arith.cmpf ogt, %158, %159 : vector<16x16xf32>
    %cst_54 = arith.constant 2.000000e-01 : f32
    %161 = vector.broadcast %cst_54 : f32 to vector<16x16xf32>
    %162 = arith.mulf %161, %158 : vector<16x16xf32>
    %163 = arith.select %160, %158, %162 : vector<16x16xi1>, vector<16x16xf32>
    %164 = arith.addf %163, %2 : vector<16x16xf32>
    %cst_55 = arith.constant dense<0xFF800000> : vector<16xf32>
    %165 = vector.multi_reduction <maximumf>, %164, %cst_55 [1] : vector<16x16xf32> to vector<16xf32>
    %166 = vector.shape_cast %165 : vector<16xf32> to vector<16x1xf32>
    %167 = vector.broadcast %166 : vector<16x1xf32> to vector<16x16xf32>
    %168 = arith.subf %164, %167 : vector<16x16xf32>
    %169 = math.exp %168 : vector<16x16xf32>
    %cst_56 = arith.constant dense<0.000000e+00> : vector<16xf32>
    %170 = vector.multi_reduction <add>, %169, %cst_56 [1] : vector<16x16xf32> to vector<16xf32>
    %171 = vector.shape_cast %170 : vector<16xf32> to vector<16x1xf32>
    %172 = tpu.reciprocal %171 {approx = true} : vector<16x1xf32> -> vector<16x1xf32>
    %173 = vector.broadcast %172 : vector<16x1xf32> to vector<16x16xf32>
    %174 = arith.mulf %169, %173 : vector<16x16xf32>
    %175 = arith.truncf %174 : vector<16x16xf32> to vector<16x16xbf16>
    %cst_57 = arith.constant dense<0.000000e+00> : vector<16x128xf32>
    %176 = tpu.matmul %175, %150, %cst_57 {dimension_numbers = #tpu.dot_dimension_numbers<[1], [0], [0], [1], [0, 0, 1, 1], [], []>} : vector<16x16xbf16>, vector<16x128xbf16>, vector<16x128xf32> -> vector<16x128xf32>
    %cst_58 = arith.constant 0.000000e+00 : f32
    %177 = vector.broadcast %cst_58 : f32 to vector<16x128xf32>
    %178 = arith.cmpf ogt, %176, %177 : vector<16x128xf32>
    %cst_59 = arith.constant 0.000000e+00 : f32
    %179 = vector.broadcast %cst_59 : f32 to vector<16x128xf32>
    %180 = arith.minimumf %176, %179 : vector<16x128xf32>
    %181 = math.exp %180 : vector<16x128xf32>
    %cst_60 = arith.constant 1.000000e+00 : f32
    %182 = vector.broadcast %cst_60 : f32 to vector<16x128xf32>
    %183 = arith.subf %181, %182 : vector<16x128xf32>
    %184 = arith.select %178, %176, %183 : vector<16x128xi1>, vector<16x128xf32>
    %185 = tpu.iota {dimensions = array<i32: 1>} : vector<16x128xi32>
    %c8_i32 = arith.constant 8 : i32
    %186 = vector.broadcast %c8_i32 : i32 to vector<16x128xi32>
    %187 = arith.cmpi slt, %185, %186 : vector<16x128xi32>
    %cst_61 = arith.constant -1.000000e+30 : f32
    %188 = vector.broadcast %cst_61 : f32 to vector<16x128xf32>
    %189 = arith.select %187, %184, %188 : vector<16x128xi1>, vector<16x128xf32>
    %cst_62 = arith.constant dense<0xFF800000> : vector<16xf32>
    %190 = vector.multi_reduction <maximumf>, %189, %cst_62 [1] : vector<16x128xf32> to vector<16xf32>
    %191 = vector.shape_cast %190 : vector<16xf32> to vector<16x1xf32>
    %192 = vector.broadcast %191 : vector<16x1xf32> to vector<16x128xf32>
    %193 = arith.subf %189, %192 : vector<16x128xf32>
    %194 = math.exp %193 : vector<16x128xf32>
    %cst_63 = arith.constant dense<0.000000e+00> : vector<16xf32>
    %195 = vector.multi_reduction <add>, %194, %cst_63 [1] : vector<16x128xf32> to vector<16xf32>
    %196 = vector.shape_cast %195 : vector<16xf32> to vector<16x1xf32>
    %197 = math.log %196 : vector<16x1xf32>
    %198 = vector.broadcast %197 : vector<16x1xf32> to vector<16x128xf32>
    %199 = arith.subf %193, %198 : vector<16x128xf32>
    %c0_64 = arith.constant 0 : index
    %c0_65 = arith.constant 0 : index
    %200 = vector.load %arg6[%c0_64, %c0_65] : memref<16x128xf32, #tpu.memory_space<vmem>>, vector<16x128xf32>
    tpu.vector_store %arg6[%c0_64, %c0_65], %199 {strides = array<i32>} : memref<16x128xf32, #tpu.memory_space<vmem>>, vector<16x128xf32>,
    return
  }
}

</mosaic_0001>

<bundles_post_ra>
// kernel: tpu_custom_call.1
= control target key start
LH: loop header
LB: loop body
LE: loop exit
PB: predicated region body
PF: predicated region fallthrough
CT: control target
= control target key end

     0   :  { %v1311_v1 = vmov 0.0   ;;  %vm1312_vm0 = vmmov 0   ;;  %vm52_vm1 = vcmask 261120   ;;  %s1537_s0 = inlined_call_operand.vmem [shape: bf16[16,32], index: 0, kind: input, shape index: {}]   ;;  %s1538_s1 = inlined_call_operand.vmem [shape: bf16[16,16], index: 1, kind: input, shape index: {}]   ;;  %s1539_s2 = inlined_call_operand.vmem [shape: bf16[32,64], index: 2, kind: input, shape index: {}]   ;;  %s1540_s3 = inlined_call_operand.vmem [shape: bf16[64,8], index: 3, kind: input, shape index: {}]   ;;  %s1541_s4 = inlined_call_operand.vmem [shape: bf16[64,128], index: 4, kind: input, shape index: {}]   ;;  %s1542_s5 = inlined_call_operand.vmem [shape: bf16[128,2], index: 5, kind: input, shape index: {}]   ;;  %s1543_s6 = inlined_call_operand.hbm [shape: f32[16,128], index: 6, kind: output, shape index: {}]  }
   0x1   :  { %v1200_v0 = vld [vmem:[%s1539_s2] sm:$0xff]   ;;  %1093 = vmatprep.subr.bf16.mxu1 %v1311_v1  ;;  %1113 = vmatprep.subr.bf16.mxu0 %v1311_v1  ;;  %v1201_v2 = vld [vmem:[%s1539_s2 + $0x8] sm:$0xff]   ;;  %v1205_v6 = vld [vmem:[%s1540_s3 + $0x10] sm:$0xff]  }
   0x2   :  { %1094 = vmatpush3.bf16.msra.mxu1 %v1200_v0  ;;  %1097 = vmatprep.mubr.msk.bf16.mxu1 %vm1312_vm0, %v1311_v1  ;;  %v1202_v3 = vld [vmem:[%s1537_s0] sm:$0xff]   ;;  %v1204_v5 = vld [vmem:[%s1540_s3 + $0x8] sm:$0xff]  }
   0x3   :  { %1095 = vmatprep.subr.bf16.mxu1 %v1311_v1  ;;  %1115 = vmatprep.mubr.msk.bf16.mxu0 %vm1312_vm0, %v1311_v1  ;;  %v1203_v4 = vld [vmem:[%s1540_s3] sm:$0xff]  }
   0x6   :  { %1096 = vmatpush3.bf16.msra.mxu1 %v1201_v2 }
   0x7   :  { %1101 = vmatprep.subr.bf16.mxu1 %v1311_v1 }
   0x9   :  { %1098 = vmatmul.mubr.msk.bf16.vlgmr.msra.gmra.mrb[0].mxu1 %vm52_vm1, %v1202_v3 }
   0xa   :  { %1102 = vmatpush3.bf16.msra.mxu1 %v1203_v4  ;;  %1109 = vmatprep.mubr.msk.bf16.mxu1 %vm1312_vm0, %v1311_v1 }
   0xb   :  { %1103 = vmatprep.subr.bf16.mxu1 %v1311_v1 }
   0xe   :  { %1104 = vmatpush3.bf16.msra.mxu1 %v1204_v5 }
   0xf   :  { %11 = vsyncpa [#allocation4], 0  ;;  %1105 = vmatprep.subr.bf16.mxu1 %v1311_v1  ;;  %v1206_v7 = vld [vmem:[%s1540_s3 + $0x18] sm:$0xff]   ;;  %v1313_v8 = vmov 0   ;;  %vm130_vm2 = vcmask 523264   ;;  %v1314_v14 = vmov 1   ;;  %v223_v24 = vlaneseq }
  0x10   :  { %1192 = vset.pattern.permute.xlu1 %v1313_v8  ;;  %1193 = vset.pattern.permute.xlu0 %v1314_v14  ;;  %s1315_s3 = smov 124   ;;  %v1316_v19 = vmov 2   ;;  %v1317_v20 = vmov 3   ;;  %v1058_v36 = vld [vmem:[%s1538_s1] sm:$0xff]   ;;  %vm237_vm5 = vcmask 130048   ;;  %s1318_s1 = smov 112  }
  0x11   :  { %v1407_v27 = vshrl.u32 %v223_v24, 7  ;;  %v1417_v43 = vunpack.c.h.bf16 %v1058_v36  ;;  %v1419_v44 = vunpack.c.l.bf16 %v1058_v36  ;;  %s1319_s11 = smov 80   ;;  %s1320_s12 = smov 96  }
  0x12   :  { %1106 = vmatpush3.bf16.msra.mxu1 %v1205_v6  ;;  %s1321_s19 = smov 16   ;;  %s1322_s22 = smov 32  }
  0x13   :  { %1107 = vmatprep.subr.bf16.mxu1 %v1311_v1  ;;  %v225_v30 = vsub.s32 0, %v1407_v27  ;;  %v329_v31 = vsub.s32 1, %v1407_v27  ;;  %v441_v32 = vsub.s32 2, %v1407_v27  ;;  %v552_v47 = vsub.s32 3, %v1407_v27  ;;  %s1323_s26 = smov 48  }
  0x16   :  { %1108 = vmatpush3.bf16.msra.mxu1 %v1206_v7 }
  0x17   :  { %1125 = vmatprep.subr.bf16.mxu1 %v1311_v1 }
  0xdc   :  { %v90_v9 = vpop.f32.mrb[0].mxu1 }
  0xdd   :  { %v1099_v10 = vpop.f32.mrb[1].mxu1 }
  0xde   :  { %v93_v11 = vpop.f32.mrb[2].mxu1 }
  0xdf   :  { %v1398_v12 = vpack.c.bf16 %v93_v11, %v90_v9  ;;  %v1100_v13 = vpop.f32.mrb[3].mxu1 }
  0xe1   :  { %1110 = vmatmul.mubr.msk.bf16.vlgmr.msra.gmra.mrb[4].mxu1 %vm130_vm2, %v1398_v12  ;;  %1114 = vmatpush3.bf16.msra.mxu0 %v1398_v12 }
  0xe2   :  { %1119 = vmatprep.subr.bf16.mxu0 %v1311_v1  ;;  %1127 = vmatprep.mubr.msk.bf16.mxu1 %vm1312_vm0, %v1311_v1 }
 0x1b4   :  { %v168_v15 = vpop.f32.mrb[4].mxu1 }
 0x1b5   :  { %216 = vperm.xlu1 %1192, %v168_v15   ;;  %177 = vrot.lane.b32.xlu0 %v168_v15, %s1315_s3  ;;  %v1111_v16 = vpop.f32.mrb[5].mxu1 }
 0x1b6   :  { %v171_v17 = vpop.f32.mrb[6].mxu1 }
 0x1b7   :  { %v1112_v18 = vpop.f32.mrb[7].mxu1 }
 0x1b9   :  { %220 = vperm.xlu1 %1192, %v171_v17   ;;  %179 = vrot.lane.b32.xlu0 %v171_v17, %s1315_s3 }
 0x1bd   :  { %1194 = vset.pattern.permute.xlu1 %v1316_v19  ;;  %320 = vperm.xlu0 %1193, %v168_v15  }
 0x1be   :  { %432 = vperm.xlu1 %1194, %v168_v15  }
 0x1c1   :  { %1197 = vset.pattern.permute.xlu0 %v1316_v19 }
 0x1c2   :  { %1195 = vset.pattern.permute.xlu1 %v1314_v14  ;;  %436 = vperm.xlu0 %1197, %v171_v17  }
 0x1c3   :  { %324 = vperm.xlu1 %1195, %v171_v17  }
 0x1c7   :  { %1196 = vset.pattern.permute.xlu1 %v1317_v20 }
 0x1c8   :  { %543 = vperm.xlu1 %1196, %v168_v15  }
 0x1cc   :  { %547 = vperm.xlu1 %1196, %v171_v17  }
 0x1d0   :  { %1199 = vset.pattern.permute.xlu1 %v1313_v8 }
 0x227   :  { %v178_v21 = vpop.permute.xlu0 %177 }
 0x228   :  { %183 = vxpose.xlu0.b32.start [1/2] (short) (narrow) %v178_v21, 8 }
 0x22b   :  { %v180_v22 = vpop.permute.xlu0 %179 }
 0x22c   :  { %184 = vxpose.xlu0.b32.end [2/2] (short) (narrow) %v180_v22, 8 }
 0x234   :  { %v217_v23 = vpop.permute.xlu1 %216 }
 0x238   :  { %v221_v25 = vpop.permute.xlu1 %220 }
 0x23c   :  { %v321_v26 = vpop.permute.xlu0 %320 }
 0x23d   :  { %v433_v28 = vpop.permute.xlu1 %432 }
 0x241   :  { %v437_v29 = vpop.permute.xlu0 %436 }
 0x242   :  { %v325_v37 = vpop.permute.xlu1 %324 }
 0x247   :  { %v544_v63 = vpop.permute.xlu1 %543 }
 0x24b   :  { %v548_v6 = vpop.permute.xlu1 %547 }
 0x255   :  { %1198 = vset.pattern.permute.xlu0 %v1313_v8 }
 0x2a8   :  { %v199_v33 = vpop.trf.xlu0 }
 0x2a9   :  { %v226_v34 = vrot.slane %v199_v33, %v225_v30  ;;  %v330_v35 = vrot.slane %v199_v33, %v329_v31  ;;  %v442_v38 = vrot.slane %v199_v33, %v441_v32  ;;  %v553_v60 = vrot.slane %v199_v33, %v552_v47 }
 0x2ab   :  { %v227_v39 = vadd.f32 %v226_v34, %v217_v23  ;;  %v228_v40 = vadd.f32 %v226_v34, %v221_v25  ;;  %v331_v41 = vadd.f32 %v330_v35, %v321_v26  ;;  %v332_v42 = vadd.f32 %v330_v35, %v325_v37 }
 0x2ac   :  { %v443_v49 = vadd.f32 %v442_v38, %v433_v28  ;;  %v444_v59 = vadd.f32 %v442_v38, %v437_v29  ;;  %v554_v3 = vadd.f32 %v553_v60, %v544_v63  ;;  %v555_v9 = vadd.f32 %v553_v60, %v548_v6 }
 0x2ad   :  { %vm230_vm3 = vcmp.gt.f32.partialorder %v228_v40, 0.0  ;;  %v232_v45 = vmul.f32 0.2, %v228_v40  ;;  %vm229_vm4 = vcmp.gt.f32.partialorder %v227_v39, 0.0  ;;  %v231_v46 = vmul.f32 0.2, %v227_v39 }
 0x2ae   :  { %vm333_vm6 = vcmp.gt.f32.partialorder %v331_v41, 0.0  ;;  %v335_v48 = vmul.f32 0.2, %v331_v41  ;;  %v336_v52 = vmul.f32 0.2, %v332_v42  ;;  %vm334_vm7 = vcmp.gt.f32.partialorder %v332_v42, 0.0 }
 0x2af   :  { %v234_v50 = vsel %vm230_vm3, %v228_v40, %v232_v45  ;;  %v233_v51 = vsel %vm229_vm4, %v227_v39, %v231_v46  ;;  %v447_v62 = vmul.f32 0.2, %v443_v49  ;;  %vm445_vm8 = vcmp.gt.f32.partialorder %v443_v49, 0.0 }
 0x2b0   :  { %v236_v53 = vadd.f32 %v1417_v43, %v234_v50  ;;  %v235_v54 = vadd.f32 %v1419_v44, %v233_v51  ;;  %v337_v55 = vsel %vm333_vm6, %v331_v41, %v335_v48  ;;  %v338_v61 = vsel %vm334_vm7, %v332_v42, %v336_v52 }
 0x2b1   :  { %v339_v58 = vadd.f32 %v1419_v44, %v337_v55  ;;  %v340_v2 = vadd.f32 %v1417_v43, %v338_v61  ;;  %v449_v4 = vsel %vm445_vm8, %v443_v49, %v447_v62  ;;  %v448_v5 = vmul.f32 0.2, %v444_v59 }
 0x2b2   :  { %v241_v56 = vsel %vm237_vm5, %v236_v53, -inf  ;;  %v238_v57 = vsel %vm237_vm5, %v235_v54, -inf  ;;  %vm446_vm9 = vcmp.gt.f32.partialorder %v444_v59, 0.0  ;;  %v451_v8 = vadd.f32 %v1419_v44, %v449_v4 }
 0x2b3   :  { %242 = vmax.xlane.f32.xlu0 %v241_v56  ;;  %239 = vmax.xlane.f32.xlu1 %v238_v57  ;;  %v341_v0 = vsel %vm237_vm5, %v339_v58, -inf  ;;  %v344_v7 = vsel %vm237_vm5, %v340_v2, -inf  ;;  %v450_v10 = vsel %vm446_vm9, %v444_v59, %v448_v5  ;;  %v558_v11 = vmul.f32 0.2, %v554_v3 }
 0x2b4   :  { %vm556_vm10 = vcmp.gt.f32.partialorder %v554_v3, 0.0  ;;  %v453_v13 = vsel %vm237_vm5, %v451_v8, -inf  ;;  %v452_v14 = vadd.f32 %v1417_v43, %v450_v10  ;;  %v559_v16 = vmul.f32 0.2, %v555_v9 }
 0x2b5   :  { %v560_v15 = vsel %vm556_vm10, %v554_v3, %v558_v11  ;;  %vm557_vm11 = vcmp.gt.f32.partialorder %v555_v9, 0.0  ;;  %vm429_vm7 = vcmask 261248   ;;  %vm540_vm8 = vcmask 392448  }
 0x2b6   :  { %v456_v17 = vsel %vm237_vm5, %v452_v14, -inf  ;;  %v562_v18 = vadd.f32 %v1419_v44, %v560_v15  ;;  %v561_v19 = vsel %vm557_vm11, %v555_v9, %v559_v16  ;;  %vm651_vm9 = vcmask 523648  }
 0x2b7   :  { %342 = vmax.xlane.f32.xlu1 %v341_v0  ;;  %v563_v21 = vadd.f32 %v1417_v43, %v561_v19 }
 0x2b8   :  { %v564_v20 = vsel %vm237_vm5, %v562_v18, -inf }
 0x2b9   :  { %v567_v22 = vsel %vm237_vm5, %v563_v21, -inf }
 0x2bb   :  { %345 = vmax.xlane.f32.xlu1 %v344_v7 }
 0x2bf   :  { %454 = vmax.xlane.f32.xlu1 %v453_v13 }
 0x2c3   :  { %457 = vmax.xlane.f32.xlu1 %v456_v17 }
 0x2c7   :  { %565 = vmax.xlane.f32.xlu1 %v564_v20 }
 0x2cb   :  { %568 = vmax.xlane.f32.xlu1 %v567_v22 }
 0x2dc   :  { %365 = vrot.lane.b32.xlu1 %v1398_v12, %s1318_s1 }
 0x340   :  { %v243_v23 = vpop.xlane.xlu0 %242  ;;  %v240_v25 = vpop.xlane.xlu1 %239 }
 0x341   :  { %v245_v26 = vsub.f32 %v236_v53, %v243_v23  ;;  %v244_v28 = vsub.f32 %v235_v54, %v240_v25 }
 0x343   :  { %v246_v29 = vmul.f32 1.442695, %v244_v28  ;;  %v248_v31 = vmul.f32 1.442695, %v245_v26 }
 0x344   :  { %v343_v32 = vpop.xlane.xlu1 %342 }
 0x345   :  { %v347_v33 = vsub.f32 %v339_v58, %v343_v32  ;;  %1219 = vpow2.f32 %v246_v29 }
 0x346   :  { %1221 = vpow2.f32 %v248_v31 }
 0x347   :  { %v349_v34 = vmul.f32 1.442695, %v347_v33 }
 0x348   :  { %v346_v35 = vpop.xlane.xlu1 %345 }
 0x349   :  { %v348_v36 = vsub.f32 %v340_v2, %v346_v35  ;;  %1223 = vpow2.f32 %v349_v34 }
 0x34b   :  { %v351_v37 = vmul.f32 1.442695, %v348_v36 }
 0x34c   :  { %v455_v38 = vpop.xlane.xlu1 %454 }
 0x34d   :  { %v459_v39 = vsub.f32 %v451_v8, %v455_v38  ;;  %1225 = vpow2.f32 %v351_v37 }
 0x34f   :  { %v1220_v40 = vpop.eup %1219  ;;  %v461_v41 = vmul.f32 1.442695, %v459_v39 }
 0x350   :  { %v458_v42 = vpop.xlane.xlu1 %457  ;;  %v250_v46 = vsel %vm237_vm5, %v1220_v40, 0.0  ;;  %v1222_v47 = vpop.eup %1221 }
 0x351   :  { %v460_v45 = vsub.f32 %v452_v14, %v458_v42  ;;  %251 = vadd.xlane.f32.xlu1 %v250_v46  ;;  %1227 = vpow2.f32 %v461_v41  ;;  %v253_v51 = vsel %vm237_vm5, %v1222_v47, 0.0 }
 0x353   :  { %v463_v48 = vmul.f32 1.442695, %v460_v45  ;;  %v1224_v52 = vpop.eup %1223 }
 0x354   :  { %v566_v49 = vpop.xlane.xlu1 %565  ;;  %v353_v56 = vsel %vm237_vm5, %v1224_v52, 0.0 }
 0x355   :  { %1229 = vpow2.f32 %v463_v48  ;;  %v570_v50 = vsub.f32 %v562_v18, %v566_v49  ;;  %254 = vadd.xlane.f32.xlu1 %v253_v51 }
 0x357   :  { %v572_v53 = vmul.f32 1.442695, %v570_v50  ;;  %v1226_v57 = vpop.eup %1225 }
 0x358   :  { %v569_v54 = vpop.xlane.xlu1 %568  ;;  %v356_v59 = vsel %vm237_vm5, %v1226_v57, 0.0 }
 0x359   :  { %1231 = vpow2.f32 %v572_v53  ;;  %v571_v55 = vsub.f32 %v563_v21, %v569_v54  ;;  %354 = vadd.xlane.f32.xlu1 %v353_v56 }
 0x35b   :  { %v574_v58 = vmul.f32 1.442695, %v571_v55  ;;  %v1228_v60 = vpop.eup %1227 }
 0x35c   :  { %v465_v63 = vsel %vm237_vm5, %v1228_v60, 0.0  ;;  %v366_v5 = vpop.permute.xlu1 %365 }
 0x35d   :  { %1233 = vpow2.f32 %v574_v58  ;;  %357 = vadd.xlane.f32.xlu1 %v356_v59 }
 0x35f   :  { %v1230_v61 = vpop.eup %1229 }
 0x360   :  { %v468_v62 = vsel %vm237_vm5, %v1230_v61, 0.0 }
 0x361   :  { %469 = vadd.xlane.f32.xlu0 %v468_v62  ;;  %466 = vadd.xlane.f32.xlu1 %v465_v63 }
 0x363   :  { %v1232_v0 = vpop.eup %1231 }
 0x364   :  { %v576_v2 = vsel %vm237_vm5, %v1232_v0, 0.0 }
 0x365   :  { %577 = vadd.xlane.f32.xlu1 %v576_v2 }
 0x367   :  { %v1234_v3 = vpop.eup %1233 }
 0x368   :  { %v579_v4 = vsel %vm237_vm5, %v1234_v3, 0.0 }
 0x369   :  { %580 = vadd.xlane.f32.xlu0 %v579_v4 }
 0x376   :  { %587 = vrot.lane.b32.xlu1 %v1398_v12, %s1319_s11  ;;  %s1324_s11 = smov 127  }
 0x37f   :  { %476 = vrot.lane.b32.xlu0 %v1398_v12, %s1320_s12 }
 0x3de   :  { %v252_v6 = vpop.xlane.xlu1 %251 }
 0x3df   :  { %1235 = vrcp.f32 %v252_v6 }
 0x3e2   :  { %v255_v7 = vpop.xlane.xlu1 %254 }
 0x3e3   :  { %1237 = vrcp.f32 %v255_v7 }
 0x3e6   :  { %v355_v8 = vpop.xlane.xlu1 %354 }
 0x3e7   :  { %1239 = vrcp.f32 %v355_v8 }
 0x3e9   :  { %v1236_v10 = vpop.eup %1235 }
 0x3ea   :  { %v358_v9 = vpop.xlane.xlu1 %357  ;;  %v258_v15 = vmul.f32 %v1236_v10, %v1220_v40 }
 0x3eb   :  { %1241 = vrcp.f32 %v358_v9 }
 0x3ed   :  { %v1238_v11 = vpop.eup %1237 }
 0x3ee   :  { %v470_v13 = vpop.xlane.xlu0 %469  ;;  %v467_v14 = vpop.xlane.xlu1 %466  ;;  %v259_v16 = vmul.f32 %v1238_v11, %v1222_v47 }
 0x3ef   :  { %1243 = vrcp.f32 %v470_v13 }
 0x3f0   :  { %1245 = vrcp.f32 %v467_v14  ;;  %v260_v17 = vpack.c.bf16 %v259_v16, %v258_v15 }
 0x3f1   :  { %v1240_v18 = vpop.eup %1239 }
 0x3f2   :  { %1116 = vmatmul.mubr.msk.bf16.vlgmr.msra.gmra.mrb[0].mxu0 %vm237_vm5, %v260_v17  ;;  %v578_v12 = vpop.xlane.xlu1 %577  ;;  %v361_v21 = vmul.f32 %v1240_v18, %v1224_v52  ;;  %v1207_v17 = vld [vmem:[%s1541_s4] sm:$0xff]  }
 0x3f3   :  { %1120 = vmatpush3.bf16.msra.mxu0 %v366_v5  ;;  %1121 = vmatprep.mubr.msk.bf16.mxu0 %vm1312_vm0, %v1311_v1  ;;  %1247 = vrcp.f32 %v578_v12 }
 0x3f4   :  { %1131 = vmatprep.subr.bf16.mxu0 %v1311_v1 }
 0x3f5   :  { %v1242_v19 = vpop.eup %1241 }
 0x3f6   :  { %v581_v20 = vpop.xlane.xlu0 %580  ;;  %v362_v22 = vmul.f32 %v1242_v19, %v1226_v57  ;;  %v588_v32 = vpop.permute.xlu1 %587 }
 0x3f7   :  { %1249 = vrcp.f32 %v581_v20  ;;  %v1208_v20 = vld [vmem:[%s1541_s4 + $0x8] sm:$0xff]  }
 0x3f8   :  { %v363_v25 = vpack.c.bf16 %v362_v22, %v361_v21 }
 0x3f9   :  { %v1244_v23 = vpop.eup %1243 }
 0x3fa   :  { %v1246_v26 = vpop.eup %1245  ;;  %v474_v28 = vmul.f32 %v1244_v23, %v1230_v61  ;;  %v477_v29 = vpop.permute.xlu0 %476  ;;  %1122 = vmatmul.mubr.msk.bf16.vlgmr.msra.gmra.mrb[4].mxu0 %vm237_vm5, %v363_v25 }
 0x3fb   :  { %v473_v31 = vmul.f32 %v1246_v26, %v1228_v60  ;;  %1126 = vmatpush3.bf16.msra.mxu1 %v477_v29  ;;  %1132 = vmatpush3.bf16.msra.mxu0 %v588_v32  ;;  %v1209_v32 = vld [vmem:[%s1541_s4 + $0x10] sm:$0xff]  }
 0x3fc   :  { %1133 = vmatprep.mubr.msk.bf16.mxu0 %vm1312_vm0, %v1311_v1  ;;  %1137 = vmatprep.subr.bf16.mxu1 %v1311_v1 }
 0x3fd   :  { %v475_v33 = vpack.c.bf16 %v474_v28, %v473_v31  ;;  %1149 = vmatprep.subr.bf16.mxu0 %v1311_v1  ;;  %v1248_v34 = vpop.eup %1247 }
 0x3fe   :  { %v584_v36 = vmul.f32 %v1248_v34, %v1232_v0 }
 0x3ff   :  { %1128 = vmatmul.mubr.msk.bf16.vlgmr.msra.gmra.mrb[8].mxu1 %vm237_vm5, %v475_v33 }
 0x400   :  { %1145 = vmatprep.mubr.msk.bf16.mxu1 %vm1312_vm0, %v1311_v1  ;;  %1138 = vmatpush3.bf16.msra.mxu1 %v1207_v17 }
 0x401   :  { %v1250_v35 = vpop.eup %1249  ;;  %1139 = vmatprep.subr.bf16.mxu1 %v1311_v1 }
 0x402   :  { %v585_v37 = vmul.f32 %v1250_v35, %v1234_v3 }
 0x404   :  { %v586_v38 = vpack.c.bf16 %v585_v37, %v584_v36  ;;  %1140 = vmatpush3.bf16.msra.mxu1 %v1208_v20  ;;  %v1210_v36 = vld [vmem:[%s1541_s4 + $0x18] sm:$0xff]  }
 0x405   :  { %1141 = vmatprep.subr.bf16.mxu1 %v1311_v1 }
 0x406   :  { %1134 = vmatmul.mubr.msk.bf16.vlgmr.msra.gmra.mrb[8].mxu0 %vm237_vm5, %v586_v38 }
 0x407   :  { %1165 = vmatprep.mubr.msk.bf16.mxu0 %vm1312_vm0, %v1311_v1 }
 0x408   :  { %1142 = vmatpush3.bf16.msra.mxu1 %v1209_v32 }
 0x409   :  { %1143 = vmatprep.subr.bf16.mxu1 %v1311_v1 }
 0x40c   :  { %1144 = vmatpush3.bf16.msra.mxu1 %v1210_v36 }
 0x40d   :  { %1169 = vmatprep.subr.bf16.mxu1 %v1311_v1 }
 0x4c5   :  { %v298_v39 = vpop.f32.mrb[0].mxu0 }
 0x4c6   :  { %v307_v40 = vmin.f32 %v298_v39, 0.0  ;;  %v1117_v41 = vpop.f32.mrb[1].mxu0  ;;  %vm305_vm12 = vcmp.gt.f32.partialorder %v298_v39, 0.0 }
 0x4c7   :  { %v301_v42 = vpop.f32.mrb[2].mxu0 }
 0x4c8   :  { %v309_v45 = vmul.f32 1.442695, %v307_v40  ;;  %v308_v46 = vmin.f32 %v301_v42, 0.0  ;;  %v1118_v47 = vpop.f32.mrb[3].mxu0  ;;  %vm306_vm13 = vcmp.gt.f32.partialorder %v301_v42, 0.0 }
 0x4c9   :  { %v1212_v47 = vld [vmem:[%s1542_s5 + $0x8] sm:$0xff]  }
 0x4ca   :  { %1251 = vpow2.f32 %v309_v45  ;;  %v311_v48 = vmul.f32 1.442695, %v308_v46 }
 0x4cc   :  { %1253 = vpow2.f32 %v311_v48 }
 0x4cd   :  { %v405_v49 = vpop.f32.mrb[4].mxu0 }
 0x4ce   :  { %v414_v50 = vmin.f32 %v405_v49, 0.0  ;;  %v1123_v51 = vpop.f32.mrb[5].mxu0  ;;  %vm412_vm14 = vcmp.gt.f32.partialorder %v405_v49, 0.0 }
 0x4cf   :  { %v408_v52 = vpop.f32.mrb[6].mxu0  ;;  %v1215_v51 = vld [vmem:[%s1542_s5 + $0x20] sm:$0xff]  }
 0x4d0   :  { %v416_v53 = vmul.f32 1.442695, %v414_v50  ;;  %v415_v54 = vmin.f32 %v408_v52, 0.0  ;;  %v1124_v55 = vpop.f32.mrb[7].mxu0  ;;  %vm413_vm15 = vcmp.gt.f32.partialorder %v408_v52, 0.0  ;;  %v1214_v50 = vld [vmem:[%s1542_s5 + $0x18] sm:$0xff]  }
 0x4d2   :  { %v516_v56 = vpop.f32.mrb[8].mxu1  ;;  %1255 = vpow2.f32 %v416_v53  ;;  %v418_v57 = vmul.f32 1.442695, %v415_v54  ;;  %v1217_v53 = vld [vmem:[%s1542_s5 + $0x30] sm:$0xff]  }
 0x4d3   :  { %v525_v58 = vmin.f32 %v516_v56, 0.0  ;;  %v1129_v59 = vpop.f32.mrb[9].mxu1  ;;  %vm523_vm1 = vcmp.gt.f32.partialorder %v516_v56, 0.0 }
 0x4d4   :  { %v519_v60 = vpop.f32.mrb[10].mxu1  ;;  %v1252_v61 = vpop.eup %1251  ;;  %1257 = vpow2.f32 %v418_v57 }
 0x4d5   :  { %v527_v62 = vmul.f32 1.442695, %v525_v58  ;;  %v526_v63 = vmin.f32 %v519_v60, 0.0  ;;  %v1130_v0 = vpop.f32.mrb[11].mxu1  ;;  %v1030_v2 = vadd.f32 -1.0, %v1252_v61  ;;  %vm524_vm3 = vcmp.gt.f32.partialorder %v519_v60, 0.0 }
 0x4d6   :  { %v1254_v3 = vpop.eup %1253  ;;  %v1218_v58 = vld [vmem:[%s1542_s5 + $0x38] sm:$0xff]  }
 0x4d7   :  { %1259 = vpow2.f32 %v527_v62  ;;  %v529_v4 = vmul.f32 1.442695, %v526_v63  ;;  %v1031_v5 = vadd.f32 -1.0, %v1254_v3  ;;  %v315_v7 = vsel %vm305_vm12, %v298_v39, %v1030_v2 }
 0x4d9   :  { %1261 = vpow2.f32 %v529_v4  ;;  %v627_v6 = vpop.f32.mrb[8].mxu0  ;;  %v316_v8 = vsel %vm306_vm13, %v301_v42, %v1031_v5  ;;  %v1211_v42 = vld [vmem:[%s1542_s5] sm:$0xff]  }
 0x4da   :  { %v636_v9 = vmin.f32 %v627_v6, 0.0  ;;  %v1135_v10 = vpop.f32.mrb[9].mxu0  ;;  %v317_v11 = vpack.c.bf16 %v316_v8, %v315_v7  ;;  %vm634_vm4 = vcmp.gt.f32.partialorder %v627_v6, 0.0  ;;  %1150 = vmatpush3.bf16.msra.mxu0 %v1211_v42 }
 0x4db   :  { %v630_v13 = vpop.f32.mrb[10].mxu0  ;;  %1151 = vmatprep.subr.bf16.mxu0 %v1311_v1 }
 0x4dc   :  { %v638_v14 = vmul.f32 1.442695, %v636_v9  ;;  %v637_v15 = vmin.f32 %v630_v13, 0.0  ;;  %v1136_v16 = vpop.f32.mrb[11].mxu0  ;;  %v1256_v12 = vpop.eup %1255  ;;  %318 = vst.msk [vmem:[#allocation2] sm:$0xff] %vm237_vm5, %v317_v11  ;;  %vm635_vm6 = vcmp.gt.f32.partialorder %v630_v13, 0.0 }
 0x4dd   :  { %v1033_v18 = vadd.f32 -1.0, %v1256_v12 }
 0x4de   :  { %1263 = vpow2.f32 %v638_v14  ;;  %v640_v19 = vmul.f32 1.442695, %v637_v15  ;;  %v1258_v21 = vpop.eup %1257  ;;  %1152 = vmatpush3.bf16.msra.mxu0 %v1212_v47 }
 0x4df   :  { %v1034_v22 = vadd.f32 -1.0, %v1258_v21  ;;  %v422_v25 = vsel %vm412_vm14, %v405_v49, %v1033_v18  ;;  %v1213_v49 = vld [vmem:[%s1542_s5 + $0x10] sm:$0xff]   ;;  %1153 = vmatprep.subr.bf16.mxu0 %v1311_v1 }
 0x4e0   :  { %1265 = vpow2.f32 %v640_v19 }
 0x4e1   :  { %v1260_v23 = vpop.eup %1259  ;;  %v423_v26 = vsel %vm413_vm15, %v408_v52, %v1034_v22  ;;  %v1216_v52 = vld [vmem:[%s1542_s5 + $0x28] sm:$0xff]   ;;  %s1325_s5 = smov [#allocation3]  }
 0x4e2   :  { %v1036_v28 = vadd.f32 -1.0, %v1260_v23  ;;  %v424_v31 = vpack.c.bf16 %v423_v26, %v422_v25  ;;  %1154 = vmatpush3.bf16.msra.mxu0 %v1213_v49  ;;  %s1009_s12 = sshll.u32 %s1325_s5, 4  ;;  %s1010_s12 = int_to_ptr.vmem [resolvable:$true] %s1009_s12 }
 0x4e3   :  { %v1262_v29 = vpop.eup %1261  ;;  %1155 = vmatprep.subr.bf16.mxu0 %v1311_v1  ;;  %s1287_s13 = scalar_lea.vmem %s1010_s12, 256  ;;  %p1292_p1 = scmp.lt.s32.totalorder %s1010_s12, %s1010_s12 }
 0x4e4   :  { %v1037_v33 = vadd.f32 -1.0, %v1262_v29  ;;  %426 = vrot.lane.b32.xlu1 %v424_v31, %s1321_s19  ;;  %v533_v34 = vsel %vm523_vm1, %v516_v56, %v1036_v28  ;;  %p1288_p0 = scmp.ne.s32.totalorder %s1010_s12, %s1287_s13  ;;  %p1293_p2 = scmp.lt.s32.totalorder %s1287_s13, %s1287_s13 }
 0x4e6   :  { %v534_v35 = vsel %vm524_vm3, %v519_v60, %v1037_v33  ;;  %1156 = vmatpush3.bf16.msra.mxu0 %v1214_v50  ;;  %p1294_p3 = por %p1293_p2, %p1292_p1 }
 0x4e7   :  { %v535_v37 = vpack.c.bf16 %v534_v35, %v533_v34  ;;  %1157 = vmatprep.subr.bf16.mxu0 %v1311_v1 }
 0x4e8   :  { %v1264_v38 = vpop.eup %1263  ;;  %p1295_p4 = pnand %p1294_p3, %p1288_p0 }
 0x4e9   :  { %v1039_v39 = vadd.f32 -1.0, %v1264_v38  ;;  %537 = vrot.lane.b32.xlu0 %v535_v37, %s1322_s22 }
 0x4ea   :  { %v1266_v40 = vpop.eup %1265  ;;  %1158 = vmatpush3.bf16.msra.mxu0 %v1215_v51 }
 0x4eb   :  { %v1040_v41 = vadd.f32 -1.0, %v1266_v40  ;;  %v644_v45 = vsel %vm634_vm4, %v627_v6, %v1039_v39  ;;  %1159 = vmatprep.subr.bf16.mxu0 %v1311_v1 }
 0x4ed   :  { %v645_v46 = vsel %vm635_vm6, %v630_v13, %v1040_v41 }
 0x4ee   :  { %v646_v48 = vpack.c.bf16 %v645_v46, %v644_v45  ;;  %1160 = vmatpush3.bf16.msra.mxu0 %v1216_v52  ;;  %v978_v46 = vand.u32 127, %v223_v24 }
 0x4ef   :  { %1161 = vmatprep.subr.bf16.mxu0 %v1311_v1 }
 0x4f0   :  { %648 = vrot.lane.b32.xlu1 %v646_v48, %s1323_s26  ;;  %vm979_vm10 = vcmp.lt.s32.totalorder %v978_v46, 8 }
 0x4f2   :  { %1162 = vmatpush3.bf16.msra.mxu0 %v1217_v53 }
 0x4f3   :  { %1163 = vmatprep.subr.bf16.mxu0 %v1311_v1 }
 0x4f6   :  { %1164 = vmatpush3.bf16.msra.mxu0 %v1218_v58 }
 0x556   :  { %v427_v54 = vpop.permute.xlu1 %426 }
 0x557   :  { %430 = vst.msk [vmem:[#allocation2] sm:$0xff] %vm429_vm7, %v427_v54 }
 0x55b   :  { %v538_v55 = vpop.permute.xlu0 %537 }
 0x55c   :  { %541 = vst.msk [vmem:[#allocation2] sm:$0xff] %vm540_vm8, %v538_v55 }
 0x562   :  { %v649_v56 = vpop.permute.xlu1 %648 }
 0x563   :  { %652 = vst.msk [vmem:[#allocation2] sm:$0xff] %vm651_vm9, %v649_v56 }
 0x56a   :  { %v653_v57 = vld [vmem:[#allocation2] sm:$0xff] }
 0x56b   :  { %1146 = vmatmul.mubr.msk.bf16.vlgmr.msra.gmra.mrb[12].mxu1 %vm130_vm2, %v653_v57 }
 0x56c   :  { %1171 = vmatprep.mubr.msk.bf16.mxu1 %vm1312_vm0, %v1311_v1 }
 0x63e   :  { %v723_v59 = vpop.f32.mrb[12].mxu1 }
 0x63f   :  { %v1147_v60 = vpop.f32.mrb[13].mxu1 }
 0x640   :  { %v726_v61 = vpop.f32.mrb[14].mxu1 }
 0x641   :  { %v730_v62 = vpack.c.bf16 %v726_v61, %v723_v59  ;;  %v1148_v63 = vpop.f32.mrb[15].mxu1 }
 0x643   :  { %1166 = vmatmul.mubr.bf16.vlgmr.msra.gmra.mrb[12].mxu0 %v730_v62  ;;  %1170 = vmatpush3.bf16.msra.mxu1 %v730_v62 }
 0x716   :  { %v829_v0 = vpop.f32.mrb[12].mxu0 }
 0x717   :  { %838 = vrot.lane.b32.xlu0 %v829_v0, %s1324_s11  ;;  %v1167_v2 = vpop.f32.mrb[13].mxu0 }
 0x718   :  { %v832_v3 = vpop.f32.mrb[14].mxu0 }
 0x719   :  { %840 = vrot.lane.b32.xlu1 %v832_v3, %s1324_s11  ;;  %v1168_v4 = vpop.f32.mrb[15].mxu0 }
 0x71b   :  { %877 = vperm.xlu0 %1198, %v829_v0  }
 0x71d   :  { %881 = vperm.xlu1 %1199, %v832_v3  }
 0x789   :  { %v839_v1 = vpop.permute.xlu0 %838 }
 0x78a   :  { %844 = vxpose.xlu1.b32.start [1/2] (short) (narrow) %v839_v1, 8 }
 0x78b   :  { %v841_v5 = vpop.permute.xlu1 %840 }
 0x78e   :  { %845 = vxpose.xlu1.b32.end [2/2] (short) (narrow) %v841_v5, 8 }
 0x79a   :  { %v878_v9 = vpop.permute.xlu0 %877 }
 0x79c   :  { %v882_v6 = vpop.permute.xlu1 %881 }
 0x80a   :  { %v860_v7 = vpop.trf.xlu1 }
 0x80b   :  { %v887_v8 = vrot.slane %v860_v7, %v225_v30 }
 0x80d   :  { %v888_v10 = vadd.f32 %v887_v8, %v878_v9  ;;  %v889_v11 = vadd.f32 %v887_v8, %v882_v6 }
 0x80f   :  { %v892_v13 = vmul.f32 0.2, %v888_v10  ;;  %v893_v14 = vmul.f32 0.2, %v889_v11  ;;  %vm890_vm0 = vcmp.gt.f32.partialorder %v888_v10, 0.0  ;;  %vm891_vm2 = vcmp.gt.f32.partialorder %v889_v11, 0.0 }
 0x811   :  { %v894_v15 = vsel %vm890_vm0, %v888_v10, %v892_v13  ;;  %v895_v16 = vsel %vm891_vm2, %v889_v11, %v893_v14 }
 0x812   :  { %v896_v17 = vadd.f32 %v1419_v44, %v894_v15  ;;  %v897_v18 = vadd.f32 %v1417_v43, %v895_v16 }
 0x814   :  { %v898_v12 = vsel %vm237_vm5, %v896_v17, -inf  ;;  %v901_v19 = vsel %vm237_vm5, %v897_v18, -inf }
 0x815   :  { %899 = vmax.xlane.f32.xlu0 %v898_v12 }
 0x819   :  { %902 = vmax.xlane.f32.xlu0 %v901_v19 }
 0x8a2   :  { %v900_v27 = vpop.xlane.xlu0 %899 }
 0x8a3   :  { %v904_v30 = vsub.f32 %v896_v17, %v900_v27 }
 0x8a5   :  { %v906_v20 = vmul.f32 1.442695, %v904_v30 }
 0x8a6   :  { %v903_v21 = vpop.xlane.xlu0 %902 }
 0x8a7   :  { %1267 = vpow2.f32 %v906_v20  ;;  %v905_v22 = vsub.f32 %v897_v18, %v903_v21 }
 0x8a9   :  { %v908_v23 = vmul.f32 1.442695, %v905_v22 }
 0x8ab   :  { %1269 = vpow2.f32 %v908_v23 }
 0x8b1   :  { %v1268_v25 = vpop.eup %1267 }
 0x8b2   :  { %v910_v26 = vsel %vm237_vm5, %v1268_v25, 0.0 }
 0x8b3   :  { %911 = vadd.xlane.f32.xlu0 %v910_v26 }
 0x8b5   :  { %v1270_v44 = vpop.eup %1269 }
 0x8b6   :  { %v913_v28 = vsel %vm237_vm5, %v1270_v44, 0.0 }
 0x8b7   :  { %914 = vadd.xlane.f32.xlu0 %v913_v28 }
 0x940   :  { %v912_v43 = vpop.xlane.xlu0 %911 }
 0x941   :  { %1271 = vrcp.f32 %v912_v43 }
 0x944   :  { %v915_v29 = vpop.xlane.xlu0 %914 }
 0x945   :  { %1273 = vrcp.f32 %v915_v29 }
 0x94b   :  { %v1272_v31 = vpop.eup %1271 }
 0x94c   :  { %v918_v33 = vmul.f32 %v1272_v31, %v1268_v25 }
 0x94f   :  { %v1274_v32 = vpop.eup %1273 }
 0x950   :  { %v919_v34 = vmul.f32 %v1274_v32, %v1270_v44 }
 0x952   :  { %v920_v35 = vpack.c.bf16 %v919_v34, %v918_v33 }
 0x954   :  { %1172 = vmatmul.mubr.msk.bf16.vlgmr.msra.gmra.mrb[16].mxu1 %vm237_vm5, %v920_v35 }
 0xa27   :  { %v958_v36 = vpop.f32.mrb[16].mxu1 }
 0xa28   :  { %v967_v37 = vmin.f32 %v958_v36, 0.0  ;;  %v1173_v38 = vpop.f32.mrb[17].mxu1  ;;  %vm965_vm11 = vcmp.gt.f32.partialorder %v958_v36, 0.0 }
 0xa29   :  { %v961_v39 = vpop.f32.mrb[18].mxu1 }
 0xa2a   :  { %v969_v40 = vmul.f32 1.442695, %v967_v37  ;;  %v968_v41 = vmin.f32 %v961_v39, 0.0  ;;  %v1174_v42 = vpop.f32.mrb[19].mxu1  ;;  %vm966_vm5 = vcmp.gt.f32.partialorder %v961_v39, 0.0 }
 0xa2c   :  { %1275 = vpow2.f32 %v969_v40  ;;  %v971_v45 = vmul.f32 1.442695, %v968_v41 }
 0xa2e   :  { %1277 = vpow2.f32 %v971_v45 }
 0xa36   :  { %v1276_v47 = vpop.eup %1275 }
 0xa37   :  { %v1055_v48 = vadd.f32 -1.0, %v1276_v47 }
 0xa38   :  { %v1278_v49 = vpop.eup %1277 }
 0xa39   :  { %v975_v50 = vsel %vm965_vm11, %v958_v36, %v1055_v48  ;;  %v1056_v51 = vadd.f32 -1.0, %v1278_v49 }
 0xa3a   :  { %v980_v52 = vsel %vm979_vm10, %v975_v50, -1e+30 }
 0xa3b   :  { %982 = vmax.xlane.f32.xlu1 %v980_v52  ;;  %v976_v53 = vsel %vm966_vm5, %v961_v39, %v1056_v51 }
 0xa3c   :  { %v981_v54 = vsel %vm979_vm10, %v976_v53, -1e+30 }
 0xa3d   :  { %984 = vmax.xlane.f32.xlu0 %v981_v54 }
 0xac8   :  { %v983_v55 = vpop.xlane.xlu1 %982 }
 0xac9   :  { %v986_v56 = vsub.f32 %v980_v52, %v983_v55 }
 0xaca   :  { %v985_v57 = vpop.xlane.xlu0 %984 }
 0xacb   :  { %v988_v58 = vmul.f32 1.442695, %v986_v56  ;;  %v987_v59 = vsub.f32 %v981_v54, %v985_v57 }
 0xacd   :  { %1279 = vpow2.f32 %v988_v58  ;;  %v990_v24 = vmul.f32 1.442695, %v987_v59 }
 0xacf   :  { %1281 = vpow2.f32 %v990_v24 }
 0xad7   :  { %v1280_v60 = vpop.eup %1279 }
 0xad8   :  { %992 = vadd.xlane.f32.xlu0 %v1280_v60 }
 0xad9   :  { %v1282_v61 = vpop.eup %1281 }
 0xadc   :  { %994 = vadd.xlane.f32.xlu0 %v1282_v61 }
 0xb65   :  { %v993_v62 = vpop.xlane.xlu0 %992 }
 0xb66   :  { %1283 = vlog2.f32 %v993_v62 }
 0xb69   :  { %v995_v63 = vpop.xlane.xlu0 %994 }
 0xb6a   :  { %1285 = vlog2.f32 %v995_v63 }
 0xb70   :  { %v1284_v0 = vpop.eup %1283 }
 0xb71   :  { %v997_v2 = vmul.f32 0.6931472, %v1284_v0 }
 0xb73   :  { %v1000_v3 = vsub.f32 %v986_v56, %v997_v2 }
 0xb74   :  { %v1286_v4 = vpop.eup %1285 }
 0xb75   :  { %1002 = vst [vmem:[#allocation3] sm:$0xff] %v1000_v3  ;;  %v999_v1 = vmul.f32 0.6931472, %v1286_v4 }
 0xb77   :  { %v1001_v5 = vsub.f32 %v987_v59, %v999_v1 }
 0xb79   :  { %1003 = vst [vmem:[#allocation3 + $0x8] sm:$0xff] %v1001_v5 }
 0xb7a   :  { %1298 = shalt.err (!%p1295_p4)
}
 0xb7b   :  { %s1299_s16 = scalar_lea.hbm %s1543_s6, 256 }
 0xb7c   :  { %p1300_p5 = scmp.ne.s32.totalorder %s1543_s6, %s1299_s16  ;;  %p1303_p6 = scmp.lt.u32.totalorder %s1299_s16, %s1543_s6 }
 0xb7e   :  { %p1305_p7 = pnand %p1303_p6, %p1300_p5 }
 0xb80   :  { %1308 = shalt.err (!%p1305_p7)
}
 0xb81   :  { %s1326_s21 = smov 128   ;;  %s1327_s22 = smov 8  }
 0xb82   :  { %1015 = dma.vmem_to_hbm [thread:$0]  %s1010_s12, 256, %s1543_s6, [#allocation4], %s1326_s21, %s1326_s21, %s1327_s22  }
 0xb83   :  { %1309 = dma.done.wait [#allocation4], 256  }
 0xb84   :  { %1310 = vsyncadd [#allocation4], 4294967040 }
 0xb85   :  { %1019 = vsyncpa [#allocation4], 1 }

</bundles_post_ra>
